<compile_context>
chip_gen: v7x
topology: tpu7x:2x2x1
jax: 0.10.0
libtpu: 0.0.40
codegen_flags: <defaults>
</compile_context>

<pallas_src>
import jax
import jax.numpy as jnp
from jax.experimental import pallas as pl
from jax.experimental.pallas import tpu as pltpu

HIDDEN = 10      # true hidden_size of the PyTorch module
H_PAD = 128      # lane-padded hidden width (zero-padded -> math is exact)
IN_FEAT = 256    # Linear(256, hidden): x_dim + y_dim == 256
X_DIM = 128
Y_DIM = 128


def mine_kernel(x_ref, y_ref, ys_ref, w1x_ref, w1y_ref, b1_ref,
                w2_ref, b2_ref, w3r_ref, b3_ref, loss_ref):
    """Fused MINE MLP + loss.

    x_ref, y_ref, ys_ref : (B, 128)  bf16   (ys = y[perm])
    w1x_ref, w1y_ref     : (128, H_PAD) bf16  (w1 split into x-rows / y-rows)
    b1_ref, b2_ref       : (1, H_PAD) f32
    w2_ref               : (H_PAD, H_PAD) bf16
    w3r_ref              : (1, H_PAD) f32     (w3 column laid out along lanes)
    b3_ref               : (1, 1) f32
    loss_ref             : (1, 1) f32 output
    """
    b = x_ref.shape[0]
    inv_b = 1.0 / b

    # ---- layer 1: bf16 MXU matmuls, f32 accumulation -----------------------
    xw = jnp.dot(x_ref[...], w1x_ref[...], preferred_element_type=jnp.float32)
    yw = jnp.dot(y_ref[...], w1y_ref[...], preferred_element_type=jnp.float32)
    ysw = jnp.dot(ys_ref[...], w1y_ref[...], preferred_element_type=jnp.float32)

    b1 = b1_ref[...]
    h1_top = jnp.maximum(xw + yw + b1, 0.0)    # joint   rows (B, H_PAD) f32
    h1_bot = jnp.maximum(xw + ysw + b1, 0.0)   # marginal rows (B, H_PAD) f32

    # ---- layer 2 ------------------------------------------------------------
    w2 = w2_ref[...]
    b2 = b2_ref[...]
    h2_top = jnp.maximum(
        jnp.dot(h1_top.astype(jnp.bfloat16), w2,
                preferred_element_type=jnp.float32) + b2, 0.0)
    h2_bot = jnp.maximum(
        jnp.dot(h1_bot.astype(jnp.bfloat16), w2,
                preferred_element_type=jnp.float32) + b2, 0.0)

    # ---- layer 3 as a VPU lane-dot (only one real output column) ------------
    w3r = w3r_ref[...]                  # (1, H_PAD) f32, zero beyond HIDDEN
    b3 = b3_ref[...]                    # (1, 1) f32
    pred_xy = jnp.sum(h2_top * w3r, axis=-1, keepdims=True) + b3    # (B, 1)
    pred_x_y = jnp.sum(h2_bot * w3r, axis=-1, keepdims=True) + b3   # (B, 1)

    # ---- MINE loss: -(mean(joint) - log(mean(exp(marginal)))) ---------------
    mean_xy = jnp.sum(pred_xy, axis=0, keepdims=True) * inv_b        # (1, 1)
    m = jnp.max(pred_x_y, axis=0, keepdims=True)                     # (1, 1)
    sum_exp = jnp.sum(jnp.exp(pred_x_y - m), axis=0, keepdims=True)  # (1, 1)
    log_mean_exp = m + jnp.log(sum_exp * inv_b)                      # (1, 1)

    loss_ref[...] = -(mean_xy - log_mean_exp)


# ----------------------------------------------------------------------------
# parameter construction (PyTorch-style init) + padding / dtype layout
# ----------------------------------------------------------------------------
def _init_linear(key, fan_in, fan_out):
    """PyTorch default init: U(-1/sqrt(fan_in), 1/sqrt(fan_in))."""
    kw, kb = jax.random.split(key)
    bound = 1.0 / float(fan_in) ** 0.5
    w = jax.random.uniform(kw, (fan_in, fan_out), jnp.float32, -bound, bound)
    b = jax.random.uniform(kb, (fan_out,), jnp.float32, -bound, bound)
    return w, b


def _pad2(a, rows, cols):
    out = jnp.zeros((rows, cols), a.dtype)
    return out.at[: a.shape[0], : a.shape[1]].set(a)


def init_mine_params(key):
    k1, k2, k3 = jax.random.split(key, 3)
    w1, b1 = _init_linear(k1, IN_FEAT, HIDDEN)   # Linear(256, 10)
    w2, b2 = _init_linear(k2, HIDDEN, HIDDEN)    # Linear(10, 10)
    w3, b3 = _init_linear(k3, HIDDEN, 1)         # Linear(10, 1)
    raw = (w1, b1, w2, b2, w3, b3)               # unpadded f32 (for reference)

    # Kernel layout: weights bf16 (MXU operands), biases / w3 row f32.
    # Padded regions are exactly zero, and zero is exact in bf16.
    w1x = _pad2(w1[:X_DIM], X_DIM, H_PAD).astype(jnp.bfloat16)
    w1y = _pad2(w1[X_DIM:], Y_DIM, H_PAD).astype(jnp.bfloat16)
    b1p = _pad2(b1[None, :], 1, H_PAD)                       # f32
    w2p = _pad2(w2, H_PAD, H_PAD).astype(jnp.bfloat16)
    b2p = _pad2(b2[None, :], 1, H_PAD)                       # f32
    w3r = _pad2(w3.T, 1, H_PAD)                              # (1, H_PAD) f32
    b3p = b3.reshape(1, 1)                                   # (1, 1) f32
    kernel_params = (w1x, w1y, b1p, w2p, b2p, w3r, b3p)
    return kernel_params, raw


# ----------------------------------------------------------------------------
# wrapper
# ----------------------------------------------------------------------------
def mine_forward(params, x, y, perm):
    """MINE loss. x: (B, 128) f32, y: (B, 128) f32, perm: (B,) int permutation."""
    w1x, w1y, b1, w2, b2, w3r, b3 = params
    B = x.shape[0]

    # Glue (cheap, no duplicated (2B,256) materialization): cast matmul inputs
    # to bf16 and apply the permutation gather in JAX.
    xb = x.astype(jnp.bfloat16)
    yb = y.astype(jnp.bfloat16)
    ysb = y[perm].astype(jnp.bfloat16)

    flops = 2 * B * X_DIM * H_PAD * 5 + 4 * B * H_PAD        # 5 MXU passes + lane dots
    bytes_accessed = (
        3 * B * X_DIM * 2                                    # bf16 activations
        + (2 * X_DIM * H_PAD + H_PAD * H_PAD) * 2            # bf16 weights
        + (2 * H_PAD + H_PAD + 1 + 1) * 4                    # f32 biases / w3 row / out
    )

    loss = pl.pallas_call(
        mine_kernel,
        out_shape=jax.ShapeDtypeStruct((1, 1), jnp.float32),
        in_specs=[pl.BlockSpec(memory_space=pltpu.MemorySpace.VMEM)] * 10,
        out_specs=pl.BlockSpec(memory_space=pltpu.MemorySpace.VMEM),
        compiler_params=pltpu.CompilerParams(vmem_limit_bytes=32 * 1024 * 1024),
        cost_estimate=pl.CostEstimate(
            flops=int(flops), transcendentals=int(B + 1),
            bytes_accessed=int(bytes_accessed)),
    )(xb, yb, ysb, w1x, w1y, b1, w2, b2, w3r, b3)
    return loss[0, 0]


# ----------------------------------------------------------------------------
# references
# ----------------------------------------------------------------------------
def mine_forward_ref(params, x, y, perm):
    """Pure-JAX replica of the kernel math (same bf16 casts) — tight check."""
    w1x, w1y, b1, w2, b2, w3r, b3 = params
    B = x.shape[0]
    xb = x.astype(jnp.bfloat16)
    yb = y.astype(jnp.bfloat16)
    ysb = y[perm].astype(jnp.bfloat16)
    xw = jnp.dot(xb, w1x, preferred_element_type=jnp.float32)
    yw = jnp.dot(yb, w1y, preferred_element_type=jnp.float32)
    ysw = jnp.dot(ysb, w1y, preferred_element_type=jnp.float32)
    h1t = jnp.maximum(xw + yw + b1, 0.0)
    h1b = jnp.maximum(xw + ysw + b1, 0.0)
    h2t = jnp.maximum(jnp.dot(h1t.astype(jnp.bfloat16), w2,
                              preferred_element_type=jnp.float32) + b2, 0.0)
    h2b = jnp.maximum(jnp.dot(h1b.astype(jnp.bfloat16), w2,
                              preferred_element_type=jnp.float32) + b2, 0.0)
    pred_xy = jnp.sum(h2t * w3r, axis=-1, keepdims=True) + b3
    pred_x_y = jnp.sum(h2b * w3r, axis=-1, keepdims=True) + b3
    mean_xy = jnp.sum(pred_xy) / B
    m = jnp.max(pred_x_y)
    log_mean_exp = m + jnp.log(jnp.sum(jnp.exp(pred_x_y - m)) / B)
    return -(mean_xy - log_mean_exp)


def mine_forward_torch_ref(raw, x, y, perm):
    """Exact f32 PyTorch-module semantics (loose check for bf16 drift)."""
    w1, b1, w2, b2, w3, b3 = raw
    B = x.shape[0]
    tiled_x = jnp.concatenate([x, x], axis=0)
    concat_y = jnp.concatenate([y, y[perm]], axis=0)
    inputs = jnp.concatenate([tiled_x, concat_y], axis=1)
    h1 = jnp.maximum(inputs @ w1 + b1, 0.0)
    h2 = jnp.maximum(h1 @ w2 + b2, 0.0)
    logits = h2 @ w3 + b3
    pred_xy, pred_x_y = logits[:B], logits[B:]
    return -(jnp.mean(pred_xy) - jnp.log(jnp.mean(jnp.exp(pred_x_y))))


if __name__ == "__main__":
    key = jax.random.PRNGKey(0)
    k_param, k_x, k_y, k_perm = jax.random.split(key, 4)

    B = 8
    x = jax.random.normal(k_x, (B, X_DIM), jnp.float32)
    y = jax.random.normal(k_y, (B, Y_DIM), jnp.float32)
    # torch.randperm(batch_size) equivalent, made deterministic here
    perm = jax.random.permutation(k_perm, B)

    params, raw = init_mine_params(k_param)

    loss = jax.block_until_ready(mine_forward(params, x, y, perm))
    loss_ref = jax.block_until_ready(mine_forward_ref(params, x, y, perm))
    loss_f32 = jax.block_until_ready(mine_forward_torch_ref(raw, x, y, perm))

    assert jnp.isfinite(loss), "non-finite loss"
    assert abs(float(loss) - float(loss_ref)) < 2e-3, (loss, loss_ref)
    assert abs(float(loss) - float(loss_f32)) < 2e-2, (loss, loss_f32)
    print("KERNEL_OK")
</pallas_src>

<mosaic_0001>
module attributes {stable_mosaic.version = 11 : i64} {
  func.func @mine_kernel(%arg0: memref<8x128xbf16, #tpu.memory_space<vmem>>, %arg1: memref<8x128xbf16, #tpu.memory_space<vmem>>, %arg2: memref<8x128xbf16, #tpu.memory_space<vmem>>, %arg3: memref<128x128xbf16, #tpu.memory_space<vmem>>, %arg4: memref<128x128xbf16, #tpu.memory_space<vmem>>, %arg5: memref<1x128xf32, #tpu.memory_space<vmem>>, %arg6: memref<128x128xbf16, #tpu.memory_space<vmem>>, %arg7: memref<1x128xf32, #tpu.memory_space<vmem>>, %arg8: memref<1x128xf32, #tpu.memory_space<vmem>>, %arg9: memref<1x1xf32, #tpu.memory_space<vmem>>, %arg10: memref<1x1xf32, #tpu.memory_space<vmem>>) attributes {dimension_semantics = [], scalar_prefetch = 0 : i64, scratch_operands = 0 : i64, tpu.core_type = #tpu.core_type<tc>} {
    %c0 = arith.constant 0 : index
    %c0_0 = arith.constant 0 : index
    %0 = vector.load %arg0[%c0, %c0_0] : memref<8x128xbf16, #tpu.memory_space<vmem>>, vector<8x128xbf16>
    %c0_1 = arith.constant 0 : index
    %c0_2 = arith.constant 0 : index
    %1 = vector.load %arg3[%c0_1, %c0_2] : memref<128x128xbf16, #tpu.memory_space<vmem>>, vector<128x128xbf16>
    %cst = arith.constant dense<0.000000e+00> : vector<8x128xf32>
    %2 = tpu.matmul %0, %1, %cst {dimension_numbers = #tpu.dot_dimension_numbers<[1], [0], [0], [1], [0, 0, 1, 1], [], []>} : vector<8x128xbf16>, vector<128x128xbf16>, vector<8x128xf32> -> vector<8x128xf32>
    %c0_3 = arith.constant 0 : index
    %c0_4 = arith.constant 0 : index
    %3 = vector.load %arg1[%c0_3, %c0_4] : memref<8x128xbf16, #tpu.memory_space<vmem>>, vector<8x128xbf16>
    %c0_5 = arith.constant 0 : index
    %c0_6 = arith.constant 0 : index
    %4 = vector.load %arg4[%c0_5, %c0_6] : memref<128x128xbf16, #tpu.memory_space<vmem>>, vector<128x128xbf16>
    %cst_7 = arith.constant dense<0.000000e+00> : vector<8x128xf32>
    %5 = tpu.matmul %3, %4, %cst_7 {dimension_numbers = #tpu.dot_dimension_numbers<[1], [0], [0], [1], [0, 0, 1, 1], [], []>} : vector<8x128xbf16>, vector<128x128xbf16>, vector<8x128xf32> -> vector<8x128xf32>
    %c0_8 = arith.constant 0 : index
    %c0_9 = arith.constant 0 : index
    %6 = vector.load %arg2[%c0_8, %c0_9] : memref<8x128xbf16, #tpu.memory_space<vmem>>, vector<8x128xbf16>
    %c0_10 = arith.constant 0 : index
    %c0_11 = arith.constant 0 : index
    %7 = vector.load %arg4[%c0_10, %c0_11] : memref<128x128xbf16, #tpu.memory_space<vmem>>, vector<128x128xbf16>
    %cst_12 = arith.constant dense<0.000000e+00> : vector<8x128xf32>
    %8 = tpu.matmul %6, %7, %cst_12 {dimension_numbers = #tpu.dot_dimension_numbers<[1], [0], [0], [1], [0, 0, 1, 1], [], []>} : vector<8x128xbf16>, vector<128x128xbf16>, vector<8x128xf32> -> vector<8x128xf32>
    %c0_13 = arith.constant 0 : index
    %c0_14 = arith.constant 0 : index
    %9 = vector.load %arg5[%c0_13, %c0_14] : memref<1x128xf32, #tpu.memory_space<vmem>>, vector<1x128xf32>
    %10 = arith.addf %2, %5 : vector<8x128xf32>
    %11 = vector.broadcast %9 : vector<1x128xf32> to vector<8x128xf32>
    %12 = arith.addf %10, %11 : vector<8x128xf32>
    %cst_15 = arith.constant 0.000000e+00 : f32
    %13 = vector.broadcast %cst_15 : f32 to vector<8x128xf32>
    %14 = arith.maximumf %12, %13 : vector<8x128xf32>
    %15 = arith.addf %2, %8 : vector<8x128xf32>
    %16 = vector.broadcast %9 : vector<1x128xf32> to vector<8x128xf32>
    %17 = arith.addf %15, %16 : vector<8x128xf32>
    %cst_16 = arith.constant 0.000000e+00 : f32
    %18 = vector.broadcast %cst_16 : f32 to vector<8x128xf32>
    %19 = arith.maximumf %17, %18 : vector<8x128xf32>
    %c0_17 = arith.constant 0 : index
    %c0_18 = arith.constant 0 : index
    %20 = vector.load %arg6[%c0_17, %c0_18] : memref<128x128xbf16, #tpu.memory_space<vmem>>, vector<128x128xbf16>
    %c0_19 = arith.constant 0 : index
    %c0_20 = arith.constant 0 : index
    %21 = vector.load %arg7[%c0_19, %c0_20] : memref<1x128xf32, #tpu.memory_space<vmem>>, vector<1x128xf32>
    %22 = arith.truncf %14 : vector<8x128xf32> to vector<8x128xbf16>
    %cst_21 = arith.constant dense<0.000000e+00> : vector<8x128xf32>
    %23 = tpu.matmul %22, %20, %cst_21 {dimension_numbers = #tpu.dot_dimension_numbers<[1], [0], [0], [1], [0, 0, 1, 1], [], []>} : vector<8x128xbf16>, vector<128x128xbf16>, vector<8x128xf32> -> vector<8x128xf32>
    %24 = vector.broadcast %21 : vector<1x128xf32> to vector<8x128xf32>
    %25 = arith.addf %23, %24 : vector<8x128xf32>
    %cst_22 = arith.constant 0.000000e+00 : f32
    %26 = vector.broadcast %cst_22 : f32 to vector<8x128xf32>
    %27 = arith.maximumf %25, %26 : vector<8x128xf32>
    %28 = arith.truncf %19 : vector<8x128xf32> to vector<8x128xbf16>
    %cst_23 = arith.constant dense<0.000000e+00> : vector<8x128xf32>
    %29 = tpu.matmul %28, %20, %cst_23 {dimension_numbers = #tpu.dot_dimension_numbers<[1], [0], [0], [1], [0, 0, 1, 1], [], []>} : vector<8x128xbf16>, vector<128x128xbf16>, vector<8x128xf32> -> vector<8x128xf32>
    %30 = vector.broadcast %21 : vector<1x128xf32> to vector<8x128xf32>
    %31 = arith.addf %29, %30 : vector<8x128xf32>
    %cst_24 = arith.constant 0.000000e+00 : f32
    %32 = vector.broadcast %cst_24 : f32 to vector<8x128xf32>
    %33 = arith.maximumf %31, %32 : vector<8x128xf32>
    %c0_25 = arith.constant 0 : index
    %c0_26 = arith.constant 0 : index
    %34 = vector.load %arg8[%c0_25, %c0_26] : memref<1x128xf32, #tpu.memory_space<vmem>>, vector<1x128xf32>
    %c0_27 = arith.constant 0 : index
    %c0_28 = arith.constant 0 : index
    %35 = vector.load %arg9[%c0_27, %c0_28] : memref<1x1xf32, #tpu.memory_space<vmem>>, vector<1x1xf32>
    %36 = vector.broadcast %34 : vector<1x128xf32> to vector<8x128xf32>
    %37 = arith.mulf %27, %36 : vector<8x128xf32>
    %cst_29 = arith.constant dense<0.000000e+00> : vector<8xf32>
    %38 = vector.multi_reduction <add>, %37, %cst_29 [1] : vector<8x128xf32> to vector<8xf32>
    %39 = vector.shape_cast %38 : vector<8xf32> to vector<8x1xf32>
    %40 = vector.broadcast %35 : vector<1x1xf32> to vector<8x1xf32>
    %41 = arith.addf %39, %40 : vector<8x1xf32>
    %42 = vector.broadcast %34 : vector<1x128xf32> to vector<8x128xf32>
    %43 = arith.mulf %33, %42 : vector<8x128xf32>
    %cst_30 = arith.constant dense<0.000000e+00> : vector<8xf32>
    %44 = vector.multi_reduction <add>, %43, %cst_30 [1] : vector<8x128xf32> to vector<8xf32>
    %45 = vector.shape_cast %44 : vector<8xf32> to vector<8x1xf32>
    %46 = vector.broadcast %35 : vector<1x1xf32> to vector<8x1xf32>
    %47 = arith.addf %45, %46 : vector<8x1xf32>
    %cst_31 = arith.constant dense<0.000000e+00> : vector<1xf32>
    %48 = vector.multi_reduction <add>, %41, %cst_31 [0] : vector<8x1xf32> to vector<1xf32>
    %49 = vector.shape_cast %48 : vector<1xf32> to vector<1x1xf32>
    %cst_32 = arith.constant 1.250000e-01 : f32
    %50 = vector.broadcast %cst_32 : f32 to vector<1x1xf32>
    %51 = arith.mulf %49, %50 : vector<1x1xf32>
    %cst_33 = arith.constant dense<0xFF800000> : vector<1xf32>
    %52 = vector.multi_reduction <maximumf>, %47, %cst_33 [0] : vector<8x1xf32> to vector<1xf32>
    %53 = vector.shape_cast %52 : vector<1xf32> to vector<1x1xf32>
    %54 = vector.broadcast %53 : vector<1x1xf32> to vector<8x1xf32>
    %55 = arith.subf %47, %54 : vector<8x1xf32>
    %56 = math.exp %55 : vector<8x1xf32>
    %cst_34 = arith.constant dense<0.000000e+00> : vector<1xf32>
    %57 = vector.multi_reduction <add>, %56, %cst_34 [0] : vector<8x1xf32> to vector<1xf32>
    %58 = vector.shape_cast %57 : vector<1xf32> to vector<1x1xf32>
    %cst_35 = arith.constant 1.250000e-01 : f32
    %59 = vector.broadcast %cst_35 : f32 to vector<1x1xf32>
    %60 = arith.mulf %58, %59 : vector<1x1xf32>
    %61 = math.log %60 : vector<1x1xf32>
    %62 = arith.addf %53, %61 : vector<1x1xf32>
    %63 = arith.subf %51, %62 : vector<1x1xf32>
    %cst_36 = arith.constant 0.000000e+00 : f32
    %64 = vector.broadcast %cst_36 : f32 to vector<1x1xf32>
    %65 = arith.subf %64, %63 : vector<1x1xf32>
    %c0_37 = arith.constant 0 : index
    %c0_38 = arith.constant 0 : index
    %66 = vector.load %arg10[%c0_37, %c0_38] : memref<1x1xf32, #tpu.memory_space<vmem>>, vector<1x1xf32>
    tpu.vector_store %arg10[%c0_37, %c0_38], %65 {strides = array<i32>} : memref<1x1xf32, #tpu.memory_space<vmem>>, vector<1x1xf32>,
    return
  }
}

</mosaic_0001>

<bundles_post_ra>
// kernel: tpu_custom_call.1
= control target key start
LH: loop header
LB: loop body
LE: loop exit
PB: predicated region body
PF: predicated region fallthrough
CT: control target
= control target key end

     0   :  { %s1116_s0 = inlined_call_operand.hbm [shape: bf16[8,128], index: 0, kind: input, shape index: {}]   ;;  %s1117_s1 = inlined_call_operand.vmem [shape: bf16[8,128], index: 1, kind: input, shape index: {}]   ;;  %s1118_s2 = inlined_call_operand.vmem [shape: bf16[8,128], index: 2, kind: input, shape index: {}]   ;;  %s1119_s3 = inlined_call_operand.hbm [shape: bf16[128,128], index: 3, kind: input, shape index: {}]   ;;  %s1120_s4 = inlined_call_operand.hbm [shape: bf16[128,128], index: 4, kind: input, shape index: {}]   ;;  %s1121_s5 = inlined_call_operand.vmem [shape: f32[1,128], index: 5, kind: input, shape index: {}]   ;;  %s1122_s6 = inlined_call_operand.hbm [shape: bf16[128,128], index: 6, kind: input, shape index: {}]   ;;  %s1123_s7 = inlined_call_operand.vmem [shape: f32[1,128], index: 7, kind: input, shape index: {}]   ;;  %s1124_s8 = inlined_call_operand.vmem [shape: f32[1,128], index: 8, kind: input, shape index: {}]   ;;  %s1125_s9 = inlined_call_operand.<no memory space> [shape: f32[1,1], index: 9, kind: input, shape index: {}]   ;;  %s1126_s10 = inlined_call_operand.hbm [shape: f32[1,1], index: 10, kind: output, shape index: {}]  }
   0x1   :  { %v15_v0 = vstv %s1125_s9 }
   0x2   :  { %16 = vst [vmem:[#allocation2] sm:$0x1] %v15_v0 }
   0x3   :  { %17 = vsyncpa [#allocation4], 0 }
   0x4   :  { %18 = vsyncpa [#allocation7], 0 }
   0x5   :  { %19 = vsyncpa [#allocation10], 0 }
   0x6   :  { %20 = vsyncpa [#allocation5], 0  ;;  %s912_s15 = smov [#allocation6]   ;;  %s794_s19 = scalar_lea.hbm %s1119_s3, 1024 }
   0x7   :  { %s40_s16 = sshll.u32 %s912_s15, 4  ;;  %p795_p0 = scmp.ne.s32.totalorder %s1119_s3, %s794_s19  ;;  %s41_s16 = int_to_ptr.vmem [resolvable:$true] %s40_s16 }
   0x8   :  { %p798_p1 = scmp.lt.u32.totalorder %s794_s19, %s1119_s3 }
   0xa   :  { %p800_p2 = pnand %p798_p1, %p795_p0 }
   0xc   :  { %803 = shalt.err (!%p800_p2)
}
   0xd   :  { %s804_s9 = scalar_lea.vmem %s41_s16, 1024  ;;  %p809_p4 = scmp.lt.s32.totalorder %s41_s16, %s41_s16 }
   0xe   :  { %p805_p3 = scmp.ne.s32.totalorder %s41_s16, %s804_s9  ;;  %p810_p5 = scmp.lt.s32.totalorder %s804_s9, %s804_s9 }
  0x10   :  { %p811_p6 = por %p810_p5, %p809_p4 }
  0x12   :  { %p812_p7 = pnand %p811_p6, %p805_p3 }
  0x14   :  { %815 = shalt.err (!%p812_p7)
}
  0x15   :  { %s913_s24 = smov 64   ;;  %s914_s25 = smov 4  }
  0x16   :  { %46 = dma.hbm_to_vmem [thread:$0]  %s1119_s3, 1024, %s41_s16, [#allocation7], %s913_s24, %s913_s24, %s914_s25  }
  0x17   :  { %s915_s28 = smov [#allocation3]   ;;  %s916_s30 = smov [#allocation8]  }
  0x18   :  { %s27_s29 = sshll.u32 %s915_s28, 4  ;;  %s52_s11 = sshll.u32 %s916_s30, 4  ;;  %s28_s29 = int_to_ptr.vmem [resolvable:$true] %s27_s29  ;;  %s53_s11 = int_to_ptr.vmem [resolvable:$true] %s52_s11 }
  0x19   :  { %s816_s14 = scalar_lea.hbm %s1116_s0, 64 }
  0x1a   :  { %p817_p8 = scmp.ne.s32.totalorder %s1116_s0, %s816_s14  ;;  %p820_p9 = scmp.lt.u32.totalorder %s816_s14, %s1116_s0 }
  0x1c   :  { %p822_p10 = pnand %p820_p9, %p817_p8 }
  0x1e   :  { %825 = shalt.err (!%p822_p10)
}
  0x1f   :  { %s826_s3 = scalar_lea.vmem %s28_s29, 64  ;;  %p831_p12 = scmp.lt.s32.totalorder %s28_s29, %s28_s29 }
  0x20   :  { %p827_p11 = scmp.ne.s32.totalorder %s28_s29, %s826_s3  ;;  %p832_p13 = scmp.lt.s32.totalorder %s826_s3, %s826_s3 }
  0x22   :  { %p833_p0 = por %p832_p13, %p831_p12 }
  0x24   :  { %p834_p1 = pnand %p833_p0, %p827_p11 }
  0x26   :  { %837 = shalt.err (!%p834_p1)
}
  0x27   :  { %30 = dma.hbm_to_vmem [thread:$0]  %s1116_s0, 64, %s28_s29, [#allocation4]  }
  0x28   :  { %s838_s23 = scalar_lea.hbm %s1120_s4, 1024 }
  0x29   :  { %p839_p2 = scmp.ne.s32.totalorder %s1120_s4, %s838_s23  ;;  %p842_p3 = scmp.lt.u32.totalorder %s838_s23, %s1120_s4 }
  0x2b   :  { %p844_p4 = pnand %p842_p3, %p839_p2 }
  0x2d   :  { %847 = shalt.err (!%p844_p4)
}
  0x2e   :  { %s848_s30 = scalar_lea.vmem %s53_s11, 1024  ;;  %p853_p6 = scmp.lt.s32.totalorder %s53_s11, %s53_s11 }
  0x2f   :  { %p849_p5 = scmp.ne.s32.totalorder %s53_s11, %s848_s30  ;;  %p854_p7 = scmp.lt.s32.totalorder %s848_s30, %s848_s30 }
  0x31   :  { %p855_p8 = por %p854_p7, %p853_p6 }
  0x33   :  { %p856_p9 = pnand %p855_p8, %p849_p5 }
  0x35   :  { %859 = shalt.err (!%p856_p9)
}
  0x36   :  { %58 = dma.hbm_to_vmem [thread:$0]  %s1120_s4, 1024, %s53_s11, [#allocation7], %s913_s24, %s913_s24, %s914_s25  }
  0x37   :  { %s917_s12 = smov [#allocation9]   ;;  %s860_s17 = scalar_lea.hbm %s1122_s6, 1024 }
  0x38   :  { %s66_s13 = sshll.u32 %s917_s12, 4  ;;  %p861_p10 = scmp.ne.s32.totalorder %s1122_s6, %s860_s17  ;;  %s67_s13 = int_to_ptr.vmem [resolvable:$true] %s66_s13 }
  0x39   :  { %p864_p11 = scmp.lt.u32.totalorder %s860_s17, %s1122_s6 }
  0x3b   :  { %p866_p12 = pnand %p864_p11, %p861_p10 }
  0x3d   :  { %869 = shalt.err (!%p866_p12)
}
  0x3e   :  { %s870_s20 = scalar_lea.vmem %s67_s13, 1024  ;;  %p875_p0 = scmp.lt.s32.totalorder %s67_s13, %s67_s13 }
  0x3f   :  { %p871_p13 = scmp.ne.s32.totalorder %s67_s13, %s870_s20  ;;  %p876_p1 = scmp.lt.s32.totalorder %s870_s20, %s870_s20 }
  0x41   :  { %p877_p2 = por %p876_p1, %p875_p0 }
  0x43   :  { %p878_p3 = pnand %p877_p2, %p871_p13 }
  0x45   :  { %881 = shalt.err (!%p878_p3)
}
  0x46   :  { %72 = dma.hbm_to_vmem [thread:$0]  %s1122_s6, 1024, %s67_s13, [#allocation10], %s913_s24, %s913_s24, %s914_s25  }
  0x47   :  { %904 = dma.done.wait [#allocation4], 64  }
  0x48   :  { %905 = vsyncadd [#allocation4], 4294967232 }
  0x49   :  { %906 = dma.done.wait [#allocation7], 2048  }
  0x4a   :  { %907 = vsyncadd [#allocation7], 4294965248 }
  0x4b   :  { %908 = dma.done.wait [#allocation10], 1024  }
  0x4c   :  { %909 = vsyncadd [#allocation10], 4294966272  ;;  %v918_v1 = vmov 0.0   ;;  %vm919_vm0 = vmmov 0   ;;  %v766_v2 = vld [vmem:[#allocation6] sm:$0xff]   ;;  %v768_v4 = vld [vmem:[#allocation6 + $0x8] sm:$0xff]  }
  0x4d   :  { %657 = vmatprep.subr.bf16.mxu0 %v918_v1  ;;  %677 = vmatprep.subr.bf16.mxu1 %v918_v1  ;;  %v767_v3 = vld [vmem:[#allocation8] sm:$0xff]   ;;  %v769_v5 = vld [vmem:[#allocation8 + $0x8] sm:$0xff]   ;;  %v770_v6 = vld [vmem:[#allocation6 + $0x10] sm:$0xff]   ;;  %vm533_vm1 = vcmask 7168   ;;  %vm565_vm2 = vcmask 0  }
  0x4e   :  { %673 = vmatprep.mubr.msk.bf16.mxu0 %vm919_vm0, %v918_v1  ;;  %693 = vmatprep.mubr.msk.bf16.mxu1 %vm919_vm0, %v918_v1  ;;  %v771_v7 = vld [vmem:[#allocation8 + $0x10] sm:$0xff]   ;;  %v772_v8 = vld [vmem:[#allocation6 + $0x18] sm:$0xff]   ;;  %v774_v10 = vld [vmem:[#allocation6 + $0x20] sm:$0xff]  }
  0x4f   :  { %658 = vmatpush3.bf16.msra.mxu0 %v766_v2  ;;  %678 = vmatpush3.bf16.msra.mxu1 %v767_v3  ;;  %v773_v9 = vld [vmem:[#allocation8 + $0x18] sm:$0xff]   ;;  %v775_v11 = vld [vmem:[#allocation8 + $0x20] sm:$0xff]   ;;  %v776_v12 = vld [vmem:[#allocation6 + $0x28] sm:$0xff]  }
  0x50   :  { %659 = vmatprep.subr.bf16.mxu0 %v918_v1  ;;  %679 = vmatprep.subr.bf16.mxu1 %v918_v1  ;;  %v777_v13 = vld [vmem:[#allocation8 + $0x28] sm:$0xff]   ;;  %v778_v14 = vld [vmem:[#allocation6 + $0x30] sm:$0xff]   ;;  %v780_v16 = vld [vmem:[#allocation6 + $0x38] sm:$0xff]  }
  0x51   :  { %v779_v15 = vld [vmem:[#allocation8 + $0x30] sm:$0xff]   ;;  %v781_v17 = vld [vmem:[#allocation8 + $0x38] sm:$0xff]   ;;  %v782_v20 = vld [vmem:[#allocation9] sm:$0xff]  }
  0x52   :  { %v92_v18 = vld [vmem:[#allocation3] sm:$0xf]  ;;  %v783_v21 = vld [vmem:[#allocation9 + $0x8] sm:$0xff]   ;;  %v784_v22 = vld [vmem:[#allocation9 + $0x10] sm:$0xff]  }
  0x53   :  { %660 = vmatpush3.bf16.msra.mxu0 %v768_v4  ;;  %680 = vmatpush3.bf16.msra.mxu1 %v769_v5  ;;  %v197_v19 = vld [vmem:[%s1117_s1] sm:$0xf]  ;;  %v786_v24 = vld [vmem:[#allocation9 + $0x20] sm:$0xff]   ;;  %v787_v25 = vld [vmem:[#allocation9 + $0x28] sm:$0xff]  }
  0x54   :  { %661 = vmatprep.subr.bf16.mxu0 %v918_v1  ;;  %681 = vmatprep.subr.bf16.mxu1 %v918_v1  ;;  %v785_v23 = vld [vmem:[#allocation9 + $0x18] sm:$0xff]   ;;  %v788_v27 = vld [vmem:[#allocation9 + $0x30] sm:$0xff]  }
  0x55   :  { %v302_v26 = vld [vmem:[%s1118_s2] sm:$0xf] }
  0x56   :  { %v789_v28 = vld [vmem:[#allocation9 + $0x38] sm:$0xff]  }
  0x57   :  { %662 = vmatpush3.bf16.msra.mxu0 %v770_v6  ;;  %682 = vmatpush3.bf16.msra.mxu1 %v771_v7  ;;  %v600_v31 = vld [vmem:[%s1121_s5] ss:$0 sm:$0xff] }
  0x58   :  { %663 = vmatprep.subr.bf16.mxu0 %v918_v1  ;;  %683 = vmatprep.subr.bf16.mxu1 %v918_v1  ;;  %v601_v54 = vld [vmem:[%s1123_s7] ss:$0 sm:$0xff]  ;;  %s920_s7 = smov [#allocation11]  }
  0x59   :  { %v610_v62 = vld [vmem:[%s1124_s8] ss:$0 sm:$0xff]  ;;  %s573_s8 = sshll.u32 %s920_s7, 4  ;;  %s574_s8 = int_to_ptr.vmem [resolvable:$true] %s573_s8 }
  0x5a   :  { %v611_v2 = vld [vmem:[#allocation2] ss:$0 sm:$0xff]  ;;  %s882_s26 = scalar_lea.vmem %s574_s8, 16  ;;  %s886_s27 = scalar_lea.vmem %s574_s8, 32 }
  0x5b   :  { %664 = vmatpush3.bf16.msra.mxu0 %v772_v8  ;;  %684 = vmatpush3.bf16.msra.mxu1 %v773_v9  ;;  %p883_p4 = scmp.ne.s32.totalorder %s574_s8, %s882_s26  ;;  %p887_p5 = scmp.lt.s32.totalorder %s574_s8, %s574_s8 }
  0x5c   :  { %665 = vmatprep.subr.bf16.mxu0 %v918_v1  ;;  %685 = vmatprep.subr.bf16.mxu1 %v918_v1  ;;  %p888_p6 = scmp.lt.s32.totalorder %s886_s27, %s882_s26 }
  0x5e   :  { %p889_p7 = por %p888_p6, %p887_p5 }
  0x5f   :  { %666 = vmatpush3.bf16.msra.mxu0 %v774_v10  ;;  %686 = vmatpush3.bf16.msra.mxu1 %v775_v11 }
  0x60   :  { %667 = vmatprep.subr.bf16.mxu0 %v918_v1  ;;  %687 = vmatprep.subr.bf16.mxu1 %v918_v1  ;;  %p890_p8 = pnand %p889_p7, %p883_p4 }
  0x63   :  { %668 = vmatpush3.bf16.msra.mxu0 %v776_v12  ;;  %688 = vmatpush3.bf16.msra.mxu1 %v777_v13 }
  0x64   :  { %669 = vmatprep.subr.bf16.mxu0 %v918_v1  ;;  %689 = vmatprep.subr.bf16.mxu1 %v918_v1 }
  0x67   :  { %670 = vmatpush3.bf16.msra.mxu0 %v778_v14  ;;  %690 = vmatpush3.bf16.msra.mxu1 %v779_v15 }
  0x68   :  { %671 = vmatprep.subr.bf16.mxu0 %v918_v1  ;;  %691 = vmatprep.subr.bf16.mxu1 %v918_v1 }
  0x6b   :  { %672 = vmatpush3.bf16.msra.mxu0 %v780_v16  ;;  %692 = vmatpush3.bf16.msra.mxu1 %v781_v17 }
  0x6c   :  { %697 = vmatprep.subr.bf16.mxu0 %v918_v1  ;;  %717 = vmatprep.subr.bf16.mxu1 %v918_v1 }
  0x6e   :  { %674 = vmatmul.mubr.bf16.vlgmr.msra.gmra.mrb[0].mxu0 %v92_v18  ;;  %694 = vmatmul.mubr.bf16.vlgmr.msra.gmra.mrb[0].mxu1 %v197_v19 }
  0x6f   :  { %698 = vmatpush3.bf16.msra.mxu0 %v767_v3  ;;  %713 = vmatprep.mubr.msk.bf16.mxu0 %vm919_vm0, %v918_v1 }
  0x70   :  { %699 = vmatprep.subr.bf16.mxu0 %v918_v1  ;;  %718 = vmatpush3.bf16.msra.mxu1 %v782_v20 }
  0x71   :  { %733 = vmatprep.mubr.msk.bf16.mxu1 %vm919_vm0, %v918_v1  ;;  %719 = vmatprep.subr.bf16.mxu1 %v918_v1 }
  0x73   :  { %700 = vmatpush3.bf16.msra.mxu0 %v769_v5 }
  0x74   :  { %701 = vmatprep.subr.bf16.mxu0 %v918_v1  ;;  %720 = vmatpush3.bf16.msra.mxu1 %v783_v21 }
  0x75   :  { %721 = vmatprep.subr.bf16.mxu1 %v918_v1 }
  0x77   :  { %702 = vmatpush3.bf16.msra.mxu0 %v771_v7 }
  0x78   :  { %703 = vmatprep.subr.bf16.mxu0 %v918_v1  ;;  %722 = vmatpush3.bf16.msra.mxu1 %v784_v22 }
  0x79   :  { %723 = vmatprep.subr.bf16.mxu1 %v918_v1 }
  0x7b   :  { %704 = vmatpush3.bf16.msra.mxu0 %v773_v9 }
  0x7c   :  { %705 = vmatprep.subr.bf16.mxu0 %v918_v1  ;;  %724 = vmatpush3.bf16.msra.mxu1 %v785_v23 }
  0x7d   :  { %725 = vmatprep.subr.bf16.mxu1 %v918_v1 }
  0x7f   :  { %706 = vmatpush3.bf16.msra.mxu0 %v775_v11 }
  0x80   :  { %707 = vmatprep.subr.bf16.mxu0 %v918_v1  ;;  %726 = vmatpush3.bf16.msra.mxu1 %v786_v24 }
  0x81   :  { %727 = vmatprep.subr.bf16.mxu1 %v918_v1 }
  0x83   :  { %708 = vmatpush3.bf16.msra.mxu0 %v777_v13 }
  0x84   :  { %709 = vmatprep.subr.bf16.mxu0 %v918_v1  ;;  %728 = vmatpush3.bf16.msra.mxu1 %v787_v25 }
  0x85   :  { %729 = vmatprep.subr.bf16.mxu1 %v918_v1 }
  0x87   :  { %710 = vmatpush3.bf16.msra.mxu0 %v779_v15 }
  0x88   :  { %711 = vmatprep.subr.bf16.mxu0 %v918_v1  ;;  %730 = vmatpush3.bf16.msra.mxu1 %v788_v27 }
  0x89   :  { %731 = vmatprep.subr.bf16.mxu1 %v918_v1 }
  0x8b   :  { %712 = vmatpush3.bf16.msra.mxu0 %v781_v17 }
  0x8c   :  { %737 = vmatprep.subr.bf16.mxu0 %v918_v1  ;;  %732 = vmatpush3.bf16.msra.mxu1 %v789_v28 }
  0x8e   :  { %714 = vmatmul.mubr.bf16.vlgmr.msra.gmra.mrb[4].mxu0 %v302_v26 }
  0x8f   :  { %738 = vmatpush3.bf16.msra.mxu0 %v782_v20  ;;  %753 = vmatprep.mubr.msk.bf16.mxu0 %vm919_vm0, %v918_v1 }
  0x90   :  { %739 = vmatprep.subr.bf16.mxu0 %v918_v1 }
  0x93   :  { %740 = vmatpush3.bf16.msra.mxu0 %v783_v21 }
  0x94   :  { %741 = vmatprep.subr.bf16.mxu0 %v918_v1 }
  0x97   :  { %742 = vmatpush3.bf16.msra.mxu0 %v784_v22 }
  0x98   :  { %743 = vmatprep.subr.bf16.mxu0 %v918_v1 }
  0x9b   :  { %744 = vmatpush3.bf16.msra.mxu0 %v785_v23 }
  0x9c   :  { %745 = vmatprep.subr.bf16.mxu0 %v918_v1 }
  0x9f   :  { %746 = vmatpush3.bf16.msra.mxu0 %v786_v24 }
  0xa0   :  { %747 = vmatprep.subr.bf16.mxu0 %v918_v1 }
  0xa3   :  { %748 = vmatpush3.bf16.msra.mxu0 %v787_v25 }
  0xa4   :  { %749 = vmatprep.subr.bf16.mxu0 %v918_v1 }
  0xa7   :  { %750 = vmatpush3.bf16.msra.mxu0 %v788_v27 }
  0xa8   :  { %751 = vmatprep.subr.bf16.mxu0 %v918_v1 }
  0xab   :  { %752 = vmatpush3.bf16.msra.mxu0 %v789_v28 }
 0x141   :  { %v191_v29 = vpop.f32.mrb[0].mxu0  ;;  %v296_v30 = vpop.f32.mrb[0].mxu1 }
 0x142   :  { %v675_v32 = vpop.f32.mrb[1].mxu0  ;;  %v344_v33 = vadd.f32 %v296_v30, %v191_v29  ;;  %v695_v35 = vpop.f32.mrb[1].mxu1 }
 0x143   :  { %v194_v34 = vpop.f32.mrb[2].mxu0  ;;  %v299_v37 = vpop.f32.mrb[2].mxu1 }
 0x144   :  { %v676_v36 = vpop.f32.mrb[3].mxu0  ;;  %v351_v38 = vadd.f32 %v600_v31, %v344_v33  ;;  %v696_v39 = vpop.f32.mrb[3].mxu1 }
 0x146   :  { %v352_v40 = vmax.f32 %v351_v38, 0.0 }
 0x148   :  { %v373_v41 = vpack.c.bf16 %v352_v40, %v352_v40 }
 0x14a   :  { %734 = vmatmul.mubr.bf16.vlgmr.msra.gmra.mrb[4].mxu1 %v373_v41 }
 0x161   :  { %v337_v42 = vpop.f32.mrb[4].mxu0 }
 0x162   :  { %v353_v43 = vadd.f32 %v337_v42, %v191_v29  ;;  %v715_v44 = vpop.f32.mrb[5].mxu0 }
 0x163   :  { %v340_v45 = vpop.f32.mrb[6].mxu0 }
 0x164   :  { %v354_v46 = vadd.f32 %v600_v31, %v353_v43  ;;  %v716_v47 = vpop.f32.mrb[7].mxu0 }
 0x166   :  { %v355_v48 = vmax.f32 %v354_v46, 0.0 }
 0x168   :  { %v469_v49 = vpack.c.bf16 %v355_v48, %v355_v48 }
 0x16a   :  { %754 = vmatmul.mubr.bf16.vlgmr.msra.gmra.mrb[8].mxu0 %v469_v49 }
 0x21d   :  { %v462_v50 = vpop.f32.mrb[4].mxu1 }
 0x21e   :  { %v735_v51 = vpop.f32.mrb[5].mxu1  ;;  %v463_v56 = vadd.f32 %v601_v54, %v462_v50 }
 0x21f   :  { %v465_v52 = vpop.f32.mrb[6].mxu1 }
 0x220   :  { %v736_v53 = vpop.f32.mrb[7].mxu1  ;;  %v468_v63 = vmax.f32 %v463_v56, 0.0 }
 0x222   :  { %v519_v1 = vmul.f32 %v610_v62, %v468_v63 }
 0x23d   :  { %v504_v55 = vpop.f32.mrb[8].mxu0 }
 0x23e   :  { %v505_v57 = vadd.f32 %v601_v54, %v504_v55  ;;  %v755_v58 = vpop.f32.mrb[9].mxu0 }
 0x23f   :  { %v507_v59 = vpop.f32.mrb[10].mxu0 }
 0x240   :  { %v510_v60 = vmax.f32 %v505_v57, 0.0  ;;  %v756_v61 = vpop.f32.mrb[11].mxu0 }
 0x242   :  { %v529_v0 = vmul.f32 %v610_v62, %v510_v60 }
 0x244   :  { %530 = vadd.xlane.f32.xlu0 %v529_v0 }
 0x248   :  { %520 = vadd.xlane.f32.xlu0 %v519_v1 }
 0x2d1   :  { %v531_v3 = vpop.xlane.xlu0 %530 }
 0x2d2   :  { %v532_v4 = vadd.f32 %v611_v2, %v531_v3 }
 0x2d4   :  { %v542_v5 = vsel %vm533_vm1, %v532_v4, -inf }
 0x2d5   :  { %v543_v6 = vrot.slane %v542_v5, 4  ;;  %v521_v14 = vpop.xlane.xlu0 %520 }
 0x2d6   :  { %v528_v15 = vadd.f32 %v611_v2, %v521_v14 }
 0x2d7   :  { %v544_v7 = vmax.f32 %v542_v5, %v543_v6 }
 0x2d8   :  { %v534_v19 = vsel %vm533_vm1, %v528_v15, 0.0 }
 0x2d9   :  { %v545_v8 = vrot.slane %v544_v7, 2  ;;  %v535_v21 = vrot.slane %v534_v19, 4 }
 0x2db   :  { %v546_v9 = vmax.f32 %v544_v7, %v545_v8  ;;  %v536_v24 = vadd.f32 %v535_v21, %v534_v19 }
 0x2dd   :  { %v547_v10 = vrot.slane %v546_v9, 1  ;;  %v537_v27 = vrot.slane %v536_v24, 2 }
 0x2df   :  { %v548_v11 = vmax.f32 %v546_v9, %v547_v10  ;;  %v538_v29 = vadd.f32 %v537_v27, %v536_v24 }
 0x2e1   :  { %v549_v12 = vsub.f32 %v532_v4, %v548_v11  ;;  %v539_v30 = vrot.slane %v538_v29, 1 }
 0x2e3   :  { %v550_v13 = vmul.f32 1.442695, %v549_v12  ;;  %v540_v31 = vadd.f32 %v539_v30, %v538_v29 }
 0x2e5   :  { %790 = vpow2.f32 %v550_v13  ;;  %v541_v35 = vmul.f32 0.125, %v540_v31 }
 0x2ef   :  { %v791_v16 = vpop.eup %790 }
 0x2f0   :  { %v552_v17 = vsel %vm533_vm1, %v791_v16, 0.0 }
 0x2f1   :  { %v553_v18 = vrot.slane %v552_v17, 4 }
 0x2f3   :  { %v554_v20 = vadd.f32 %v553_v18, %v552_v17 }
 0x2f5   :  { %v555_v22 = vrot.slane %v554_v20, 2 }
 0x2f7   :  { %v556_v23 = vadd.f32 %v555_v22, %v554_v20 }
 0x2f9   :  { %v557_v25 = vrot.slane %v556_v23, 1 }
 0x2fb   :  { %v558_v26 = vadd.f32 %v557_v25, %v556_v23 }
 0x2fd   :  { %v559_v28 = vmul.f32 0.125, %v558_v26 }
 0x2ff   :  { %792 = vlog2.f32 %v559_v28 }
 0x309   :  { %v793_v32 = vpop.eup %792 }
 0x30a   :  { %v561_v33 = vmul.f32 0.6931472, %v793_v32 }
 0x30c   :  { %v562_v34 = vadd.f32 %v561_v33, %v548_v11 }
 0x30e   :  { %v563_v36 = vsub.f32 %v541_v35, %v562_v34 }
 0x310   :  { %v564_v37 = vsub.f32 0.0, %v563_v36 }
 0x312   :  { %566 = vst.msk [vmem:[#allocation11] sm:$0x1] %vm565_vm2, %v564_v37 }
 0x313   :  { %893 = shalt.err (!%p890_p8)
}
 0x314   :  { %s894_s0 = scalar_lea.hbm %s1126_s10, 16 }
 0x315   :  { %p895_p9 = scmp.ne.s32.totalorder %s1126_s10, %s894_s0  ;;  %p898_p10 = scmp.lt.u32.totalorder %s894_s0, %s1126_s10 }
 0x317   :  { %p900_p11 = pnand %p898_p10, %p895_p9 }
 0x319   :  { %903 = shalt.err (!%p900_p11)
}
 0x31a   :  { %576 = dma.vmem_to_hbm [thread:$0]  %s574_s8, 16, %s1126_s10, [#allocation5]  }
 0x31b   :  { %910 = dma.done.wait [#allocation5], 16  }
 0x31c   :  { %911 = vsyncadd [#allocation5], 4294967280 }
 0x31d   :  { %580 = vsyncpa [#allocation4], 1 }
 0x31e   :  { %581 = vsyncpa [#allocation7], 1 }
 0x31f   :  { %582 = vsyncpa [#allocation10], 1 }
 0x320   :  { %583 = vsyncpa [#allocation5], 1 }

</bundles_post_ra>
